<compile_context>
chip_gen: v5e
topology: v5e:2x2
jax: 0.10.0
libtpu: 0.0.40
codegen_flags: <defaults>
</compile_context>

<pallas_src>
import jax
import jax.numpy as jnp
from jax.experimental import pallas as pl
from jax.experimental.pallas import tpu as pltpu


def _feature_attention_kernel(xT_ref, w1_ref, b1_ref, w2_ref, b2_ref, oT_ref):
    # xT_ref: (F, TILE_N) bf16     w1_ref: (H, F) bf16    b1_ref: (H, 1) f32
    # w2_ref: (F, H) bf16          b2_ref: (F, 1) f32     oT_ref: (F, TILE_N) f32
    xT = xT_ref[...]
    # fc1 + ReLU:  hT = W1 @ xT  (f32 accumulation on the MXU)
    h = jnp.dot(w1_ref[...], xT, preferred_element_type=jnp.float32) + b1_ref[...]
    h = jnp.maximum(h, 0.0)
    # Explicit bf16 downcast of the f32 accumulator before the 2nd MXU pass.
    h = h.astype(jnp.bfloat16)
    # fc2 + sigmoid:  yT = W2 @ hT
    y = jnp.dot(w2_ref[...], h, preferred_element_type=jnp.float32) + b2_ref[...]
    oT_ref[...] = jax.nn.sigmoid(y).astype(oT_ref.dtype)


def feature_attention(x, fc1_w, fc1_b, fc2_w, fc2_b, *, tile_n=2048):
    """x: (B, C, F, W) f32.  Params in PyTorch-native layout:
    fc1_w (128, F), fc1_b (128,), fc2_w (F, 128), fc2_b (F,).
    Returns (B, C, F, W) f32 attention weights (same semantics as the module)."""
    B, C, F, W = x.shape
    H = fc1_w.shape[0]
    N = B * C * W

    # Exact PyTorch `x.view(B*C*W, F)` semantics on the row-major (B,C,F,W) tensor.
    # TODO(synk): this faithfully reproduces the module's view() (it interleaves
    # the F and W axes); if a permute(0,1,3,2) was intended upstream, add it here.
    x_flat = x.reshape(N, F)

    # Lane-dense transposed layout; bf16 halves the x HBM read traffic.
    xT = x_flat.T.astype(jnp.bfloat16)                        # (F, N)

    # Tile selection: multiple of 128 on the lane axis, clamped for small N.
    tile = max(128, min(int(tile_n), ((N + 127) // 128) * 128))
    tile = (tile // 128) * 128
    n_pad = ((N + tile - 1) // tile) * tile
    if n_pad != N:
        xT = jnp.pad(xT, ((0, 0), (0, n_pad - N)))
    grid = n_pad // tile

    w1 = fc1_w.astype(jnp.bfloat16)                           # (H, F)
    w2 = fc2_w.astype(jnp.bfloat16)                           # (F, H)
    b1 = fc1_b.reshape(H, 1).astype(jnp.float32)
    b2 = fc2_b.reshape(F, 1).astype(jnp.float32)

    # Tiny invariant params: whole-array VMEM residency, no per-step
    # double-buffering / re-DMA across the grid.
    vmem_spec = pl.BlockSpec(memory_space=pltpu.MemorySpace.VMEM)

    # Rough per-step VMEM footprint: 2x (in + out) blocks + h/y temporaries
    # + params.  Used to raise the scoped VMEM limit when tile_n is pushed up.
    per_step = (2 * (F * tile * 2 + F * tile * 4)
                + H * tile * 4 + H * tile * 2 + F * tile * 4
                + 2 * H * F * 2 + (H + F) * 4)
    vmem_limit = int(min(64 * 1024 * 1024, max(32 * 1024 * 1024, 4 * per_step)))

    cost = pl.CostEstimate(
        flops=4 * n_pad * F * H,                 # two matmuls
        transcendentals=n_pad * F,               # one exp per sigmoid output
        bytes_accessed=(F * n_pad * 2            # bf16 x read
                        + F * n_pad * 4          # f32 out write
                        + 2 * H * F * 2 + (H + F) * 4),
    )

    out_T = pl.pallas_call(
        _feature_attention_kernel,
        out_shape=jax.ShapeDtypeStruct((F, n_pad), jnp.float32),
        grid_spec=pltpu.PrefetchScalarGridSpec(
            num_scalar_prefetch=0,
            grid=(grid,),
            in_specs=[
                pl.BlockSpec((F, tile), lambda i: (0, i)),    # x columns (lane-dense)
                vmem_spec,                                    # fc1 weight (H, F)
                vmem_spec,                                    # fc1 bias   (H, 1)
                vmem_spec,                                    # fc2 weight (F, H)
                vmem_spec,                                    # fc2 bias   (F, 1)
            ],
            out_specs=pl.BlockSpec((F, tile), lambda i: (0, i)),
        ),
        compiler_params=pltpu.CompilerParams(
            dimension_semantics=("parallel",),
            vmem_limit_bytes=vmem_limit),
        cost_estimate=cost,
    )(xT, w1, b1, w2, b2)

    return out_T[:, :N].T.reshape(B, C, F, W)


def _reference_f32(x, fc1_w, fc1_b, fc2_w, fc2_b):
    B, C, F, W = x.shape
    xf = x.reshape(B * C * W, F)
    h = jnp.maximum(xf @ fc1_w.T + fc1_b, 0.0)
    y = jax.nn.sigmoid(h @ fc2_w.T + fc2_b)
    return y.reshape(B, C, F, W)


def _reference_bf16(x, fc1_w, fc1_b, fc2_w, fc2_b):
    # Mirrors the kernel's precision: bf16 MXU operands, f32 accumulate/epilogue.
    B, C, F, W = x.shape
    xf = x.reshape(B * C * W, F).astype(jnp.bfloat16)
    h = jnp.dot(xf, fc1_w.T.astype(jnp.bfloat16),
                preferred_element_type=jnp.float32) + fc1_b
    h = jnp.maximum(h, 0.0).astype(jnp.bfloat16)
    y = jnp.dot(h, fc2_w.T.astype(jnp.bfloat16),
                preferred_element_type=jnp.float32) + fc2_b
    return jax.nn.sigmoid(y).reshape(B, C, F, W)


if __name__ == "__main__":
    key = jax.random.PRNGKey(0)
    B, C, F, W = 2, 4, 16, 16          # batch, channels, num_features, window
    HIDDEN = 128                       # fixed by the module (fc1: F -> 128)

    k_x, k_w1, k_b1, k_w2, k_b2 = jax.random.split(key, 5)
    x = jax.random.normal(k_x, (B, C, F, W), dtype=jnp.float32)

    # Parameters in PyTorch-native layout: fc1.weight (128, F), fc2.weight (F, 128).
    fc1_w = jax.random.normal(k_w1, (HIDDEN, F), dtype=jnp.float32) / jnp.sqrt(F)
    fc1_b = jax.random.normal(k_b1, (HIDDEN,), dtype=jnp.float32) / jnp.sqrt(F)
    fc2_w = jax.random.normal(k_w2, (F, HIDDEN), dtype=jnp.float32) / jnp.sqrt(HIDDEN)
    fc2_b = jax.random.normal(k_b2, (F,), dtype=jnp.float32) / jnp.sqrt(HIDDEN)

    out = feature_attention(x, fc1_w, fc1_b, fc2_w, fc2_b)
    out = jax.block_until_ready(out)
    assert out.shape == (B, C, F, W)

    ref16 = _reference_bf16(x, fc1_w, fc1_b, fc2_w, fc2_b)
    ref32 = _reference_f32(x, fc1_w, fc1_b, fc2_w, fc2_b)
    assert jnp.allclose(out, ref16, atol=1e-3, rtol=1e-3), "mismatch vs bf16 reference"
    assert jnp.allclose(out, ref32, atol=3e-2, rtol=0.0), "mismatch vs f32 reference"

    # Exercise the multi-step grid + padding path (N = 1800, tile = 512, grid = 4).
    B2, C2, W2 = 3, 6, 100
    x2 = jax.random.normal(key, (B2, C2, F, W2), dtype=jnp.float32)
    out2 = jax.block_until_ready(
        feature_attention(x2, fc1_w, fc1_b, fc2_w, fc2_b, tile_n=512))
    ref2 = _reference_bf16(x2, fc1_w, fc1_b, fc2_w, fc2_b)
    assert out2.shape == (B2, C2, F, W2)
    assert jnp.allclose(out2, ref2, atol=1e-3, rtol=1e-3), "mismatch (padded/tiled case)"

    print("KERNEL_OK")
</pallas_src>

<mosaic_0001>
module attributes {stable_mosaic.version = 11 : i64} {
  func.func @_feature_attention_kernel(%arg0: i32, %arg1: memref<16x128xbf16, #tpu.memory_space<vmem>>, %arg2: memref<128x16xbf16, #tpu.memory_space<vmem>>, %arg3: memref<128x1xf32, #tpu.memory_space<vmem>>, %arg4: memref<16x128xbf16, #tpu.memory_space<vmem>>, %arg5: memref<16x1xf32, #tpu.memory_space<vmem>>, %arg6: memref<16x128xf32, #tpu.memory_space<vmem>>) attributes {dimension_semantics = [#tpu.dimension_semantics<parallel>], iteration_bounds = array<i64: 1>, scalar_prefetch = 0 : i64, scratch_operands = 0 : i64, tpu.core_type = #tpu.core_type<tc>, window_params = [{transform_indices = @transform_0, window_bounds = array<i64: 16, 128>}, {pipeline_mode = #tpu.pipeline_mode<synchronous>, transform_indices = @transform_1, window_bounds = array<i64: 128, 16>}, {pipeline_mode = #tpu.pipeline_mode<synchronous>, transform_indices = @transform_2, window_bounds = array<i64: 128, 1>}, {pipeline_mode = #tpu.pipeline_mode<synchronous>, transform_indices = @transform_3, window_bounds = array<i64: 16, 128>}, {pipeline_mode = #tpu.pipeline_mode<synchronous>, transform_indices = @transform_4, window_bounds = array<i64: 16, 1>}, {transform_indices = @transform_5, window_bounds = array<i64: 16, 128>}]} {
    %c0 = arith.constant 0 : index
    %c0_0 = arith.constant 0 : index
    %0 = vector.load %arg1[%c0, %c0_0] : memref<16x128xbf16, #tpu.memory_space<vmem>>, vector<16x128xbf16>
    %c0_1 = arith.constant 0 : index
    %c0_2 = arith.constant 0 : index
    %1 = vector.load %arg2[%c0_1, %c0_2] : memref<128x16xbf16, #tpu.memory_space<vmem>>, vector<128x16xbf16>
    %cst = arith.constant dense<0.000000e+00> : vector<128x128xf32>
    %2 = tpu.matmul %1, %0, %cst {dimension_numbers = #tpu.dot_dimension_numbers<[1], [0], [0], [1], [0, 0, 1, 1], [], []>} : vector<128x16xbf16>, vector<16x128xbf16>, vector<128x128xf32> -> vector<128x128xf32>
    %c0_3 = arith.constant 0 : index
    %c0_4 = arith.constant 0 : index
    %3 = vector.load %arg3[%c0_3, %c0_4] : memref<128x1xf32, #tpu.memory_space<vmem>>, vector<128x1xf32>
    %4 = vector.broadcast %3 : vector<128x1xf32> to vector<128x128xf32>
    %5 = arith.addf %2, %4 : vector<128x128xf32>
    %cst_5 = arith.constant 0.000000e+00 : f32
    %6 = vector.broadcast %cst_5 : f32 to vector<128x128xf32>
    %7 = arith.maximumf %5, %6 : vector<128x128xf32>
    %8 = arith.truncf %7 : vector<128x128xf32> to vector<128x128xbf16>
    %c0_6 = arith.constant 0 : index
    %c0_7 = arith.constant 0 : index
    %9 = vector.load %arg4[%c0_6, %c0_7] : memref<16x128xbf16, #tpu.memory_space<vmem>>, vector<16x128xbf16>
    %cst_8 = arith.constant dense<0.000000e+00> : vector<16x128xf32>
    %10 = tpu.matmul %9, %8, %cst_8 {dimension_numbers = #tpu.dot_dimension_numbers<[1], [0], [0], [1], [0, 0, 1, 1], [], []>} : vector<16x128xbf16>, vector<128x128xbf16>, vector<16x128xf32> -> vector<16x128xf32>
    %c0_9 = arith.constant 0 : index
    %c0_10 = arith.constant 0 : index
    %11 = vector.load %arg5[%c0_9, %c0_10] : memref<16x1xf32, #tpu.memory_space<vmem>>, vector<16x1xf32>
    %12 = vector.broadcast %11 : vector<16x1xf32> to vector<16x128xf32>
    %13 = arith.addf %10, %12 : vector<16x128xf32>
    %14 = arith.negf %13 : vector<16x128xf32>
    %15 = math.exp %14 : vector<16x128xf32>
    %cst_11 = arith.constant 1.000000e+00 : f32
    %16 = vector.broadcast %cst_11 : f32 to vector<16x128xf32>
    %17 = arith.addf %16, %15 : vector<16x128xf32>
    %18 = arith.divf %16, %17 : vector<16x128xf32>
    %c0_12 = arith.constant 0 : index
    %c0_13 = arith.constant 0 : index
    %19 = vector.load %arg6[%c0_12, %c0_13] : memref<16x128xf32, #tpu.memory_space<vmem>>, vector<16x128xf32>
    tpu.vector_store %arg6[%c0_12, %c0_13], %18 {strides = array<i32>} : memref<16x128xf32, #tpu.memory_space<vmem>>, vector<16x128xf32>,
    return
  }
  func.func @transform_0(%arg0: i32) -> (i32, i32) {
    %c0_i32 = arith.constant 0 : i32
    %c0_i32_0 = arith.constant 0 : i32
    return %c0_i32, %arg0 : i32, i32
  }
  func.func @transform_1(%arg0: i32) -> (i32, i32) {
    %c0_i32 = arith.constant 0 : i32
    %c0_i32_0 = arith.constant 0 : i32
    %c0_i32_1 = arith.constant 0 : i32
    return %c0_i32, %c0_i32_0 : i32, i32
  }
  func.func @transform_2(%arg0: i32) -> (i32, i32) {
    %c0_i32 = arith.constant 0 : i32
    %c0_i32_0 = arith.constant 0 : i32
    %c0_i32_1 = arith.constant 0 : i32
    return %c0_i32, %c0_i32_0 : i32, i32
  }
  func.func @transform_3(%arg0: i32) -> (i32, i32) {
    %c0_i32 = arith.constant 0 : i32
    %c0_i32_0 = arith.constant 0 : i32
    %c0_i32_1 = arith.constant 0 : i32
    return %c0_i32, %c0_i32_0 : i32, i32
  }
  func.func @transform_4(%arg0: i32) -> (i32, i32) {
    %c0_i32 = arith.constant 0 : i32
    %c0_i32_0 = arith.constant 0 : i32
    %c0_i32_1 = arith.constant 0 : i32
    return %c0_i32, %c0_i32_0 : i32, i32
  }
  func.func @transform_5(%arg0: i32) -> (i32, i32) {
    %c0_i32 = arith.constant 0 : i32
    %c0_i32_0 = arith.constant 0 : i32
    return %c0_i32, %arg0 : i32, i32
  }
}

</mosaic_0001>

<bundles_post_ra>
// kernel: tpu_custom_call.1
= control target key start
LH: loop header
LB: loop body
LE: loop exit
PB: predicated region body
PF: predicated region fallthrough
CT: control target
= control target key end

     0   :  { %v475_v2 = vmov 0   ;;  %vm182_vm0 = vcmask 130048   ;;  %s610_s0 = inlined_call_operand.vmem [shape: bf16[16,128], index: 0, kind: input, shape index: {}]   ;;  %s611_s1 = inlined_call_operand.vmem [shape: bf16[128,16], index: 1, kind: input, shape index: {}]   ;;  %s612_s2 = inlined_call_operand.vmem [shape: f32[128,1], index: 2, kind: input, shape index: {}]   ;;  %s613_s3 = inlined_call_operand.vmem [shape: bf16[16,128], index: 3, kind: input, shape index: {}]   ;;  %s614_s4 = inlined_call_operand.vmem [shape: f32[16,1], index: 4, kind: input, shape index: {}]   ;;  %s615_s5 = inlined_call_operand.hbm [shape: f32[16,128], index: 5, kind: output, shape index: {}]  }
   0x1   :  { %v54_v0 = vld [vmem:[%s612_s2 + $0x70] sm:$0xff]  ;;  %v422_v1 = vld [vmem:[%s610_s0] sm:$0xff]  ;;  %438 = vset.pattern.permute.xlu0 %v475_v2  ;;  %439 = vset.pattern.permute.xlu1 %v475_v2  ;;  %v426_v5 = vld [vmem:[%s611_s1 + $0x18] sm:$0xff] }
   0x2   :  { %v423_v3 = vld [vmem:[%s611_s1] sm:$0xff]  ;;  %128 = vperm.xlu0 %438, %v54_v0   ;;  %214 = vmatpush.bf16.msra.mxu0 %v422_v1  ;;  %v429_v6 = vld [vmem:[%s611_s1 + $0x30] sm:$0xff]  ;;  %v55_v8 = vld [vmem:[%s612_s2 + $0x78] sm:$0xff] }
   0x3   :  { %v52_v4 = vld [vmem:[%s612_s2 + $0x60] sm:$0xff]  ;;  %432 = vmatpush.bf16.msra.mxu2 %v422_v1  ;;  %433 = vmatpush.bf16.msra.mxu3 %v422_v1  ;;  %v50_v7 = vld [vmem:[%s612_s2 + $0x50] sm:$0xff] }
   0x4   :  { %118 = vperm.xlu1 %439, %v52_v4   ;;  %440 = vset.pattern.permute.xlu2 %v475_v2 }
   0x5   :  { %408 = vmatmul.msk.bf16.vlgmr.msra.gmra.mxu0 %vm182_vm0, %v423_v3  ;;  %108 = vperm.xlu2 %440, %v50_v7  }
   0x6   :  { %411 = vmatmul.msk.bf16.vlgmr.msra.gmra.mxu2 %vm182_vm0, %v426_v5  ;;  %414 = vmatmul.msk.bf16.vlgmr.msra.gmra.mxu3 %vm182_vm0, %v429_v6 }
   0x7   :  { %10 = vsyncpa [#allocation3], 0  ;;  %v53_v9 = vld [vmem:[%s612_s2 + $0x68] sm:$0xff]  ;;  %v51_v10 = vld [vmem:[%s612_s2 + $0x58] sm:$0xff]  ;;  %s360_s22 = sshll.u32 %s615_s5, 4  ;;  %s477_s23 = smov 128   ;;  %s361_s22 = int_to_ptr.hbm [resolvable:$true] %s360_s22 }
   0x8   :  { %v48_v11 = vld [vmem:[%s612_s2 + $0x40] sm:$0xff]  ;;  %v424_v12 = vld [vmem:[%s611_s1 + $0x8] sm:$0xff]  ;;  %v430_v15 = vld [vmem:[%s611_s1 + $0x38] sm:$0xff]  ;;  %s478_s24 = smov 8  }
   0x9   :  { %v49_v13 = vld [vmem:[%s612_s2 + $0x48] sm:$0xff]  ;;  %v427_v14 = vld [vmem:[%s611_s1 + $0x20] sm:$0xff]  ;;  %v46_v16 = vld [vmem:[%s612_s2 + $0x30] sm:$0xff] }
   0xa   :  { %133 = vperm.xlu0 %438, %v55_v8   ;;  %v47_v17 = vld [vmem:[%s612_s2 + $0x38] sm:$0xff]  ;;  %v44_v18 = vld [vmem:[%s612_s2 + $0x20] sm:$0xff]  ;;  %v45_v19 = vld [vmem:[%s612_s2 + $0x28] sm:$0xff] }
   0xb   :  { %v42_v20 = vld [vmem:[%s612_s2 + $0x10] sm:$0xff]  ;;  %v43_v22 = vld [vmem:[%s612_s2 + $0x18] sm:$0xff]  ;;  %v428_v23 = vld [vmem:[%s611_s1 + $0x28] sm:$0xff] }
   0xc   :  { %123 = vperm.xlu1 %439, %v53_v9   ;;  %v425_v21 = vld [vmem:[%s611_s1 + $0x10] sm:$0xff]  ;;  %v40_v24 = vld [vmem:[%s612_s2] sm:$0xff]  ;;  %v41_v25 = vld [vmem:[%s612_s2 + $0x8] sm:$0xff] }
   0xd   :  { %113 = vperm.xlu2 %440, %v51_v10   ;;  %v282_v26 = vld [vmem:[%s614_s4] sm:$0xff]  ;;  %v283_v27 = vld [vmem:[%s614_s4 + $0x8] sm:$0xff] }
  0x12   :  { %98 = vperm.xlu0 %438, %v48_v11  }
  0x14   :  { %103 = vperm.xlu1 %439, %v49_v13  }
  0x15   :  { %409 = vmatmul.msk.bf16.gmra.mxu0 %vm182_vm0, %v424_v12  ;;  %88 = vperm.xlu2 %440, %v46_v16  }
  0x16   :  { %412 = vmatmul.msk.bf16.gmra.mxu2 %vm182_vm0, %v427_v14  ;;  %415 = vmatmul.msk.bf16.gmra.mxu3 %vm182_vm0, %v430_v15 }
  0x1a   :  { %93 = vperm.xlu0 %438, %v47_v17  }
  0x1c   :  { %78 = vperm.xlu1 %439, %v44_v18  }
  0x1d   :  { %83 = vperm.xlu2 %440, %v45_v19  }
  0x22   :  { %68 = vperm.xlu0 %438, %v42_v20  }
  0x24   :  { %73 = vperm.xlu1 %439, %v43_v22  }
  0x25   :  { %410 = vmatmul.msk.bf16.gmra.mxu0 %vm182_vm0, %v425_v21  ;;  %58 = vperm.xlu2 %440, %v40_v24  }
  0x26   :  { %413 = vmatmul.msk.bf16.gmra.mxu2 %vm182_vm0, %v428_v23 }
  0x2a   :  { %63 = vperm.xlu0 %438, %v41_v25  }
  0x2c   :  { %286 = vperm.xlu1 %439, %v282_v26  }
  0x2d   :  { %291 = vperm.xlu2 %440, %v283_v27  }
  0x5f   :  { %v109_v37 = vpop.permute.xlu2 %108 }
  0x67   :  { %v114_v49 = vpop.permute.xlu2 %113 }
  0x6f   :  { %v89_v60 = vpop.permute.xlu2 %88 }
  0x74   :  { %v129_v31 = vpop.permute.xlu0 %128 }
  0x76   :  { %v119_v35 = vpop.permute.xlu1 %118 }
  0x77   :  { %v84_v10 = vpop.permute.xlu2 %83 }
  0x7c   :  { %v134_v36 = vpop.permute.xlu0 %133 }
  0x7e   :  { %v124_v41 = vpop.permute.xlu1 %123 }
  0x7f   :  { %v59_v26 = vpop.permute.xlu2 %58 }
  0x82   :  { %v598_v28 = vpop.f32.mrf.mxu0 }
  0x84   :  { %v99_v42 = vpop.permute.xlu0 %98 }
  0x86   :  { %v104_v56 = vpop.permute.xlu1 %103 }
  0x89   :  { %v231_v29 = vpop.f32.mrf.mxu2  ;;  %v246_v30 = vpop.f32.mrf.mxu3 }
  0x8a   :  { %v600_v32 = vpop.f32.mrf.mxu0  ;;  %v247_v46 = vadd.f32 %v246_v30, %v119_v35  ;;  %v232_v12 = vadd.f32 %v231_v29, %v89_v60 }
  0x8c   :  { %v268_v53 = vmax.f32 %v247_v46, 0.0  ;;  %v94_v59 = vpop.permute.xlu0 %93  ;;  %v262_v17 = vmax.f32 %v232_v12, 0.0 }
  0x8e   :  { %v79_v2 = vpop.permute.xlu1 %78 }
  0x91   :  { %v233_v33 = vpop.f32.mrf.mxu2  ;;  %v248_v34 = vpop.f32.mrf.mxu3 }
  0x92   :  { %v221_v38 = vpop.f32.mrf.mxu0  ;;  %v249_v47 = vadd.f32 %v248_v34, %v124_v41  ;;  %v234_v7 = vadd.f32 %v233_v33, %v94_v59  ;;  %v217_v33 = vadd.f32 %v598_v28, %v59_v26 }
  0x94   :  { %v269_v54 = vmax.f32 %v249_v47, 0.0  ;;  %v69_v6 = vpop.permute.xlu0 %68  ;;  %v263_v14 = vmax.f32 %v234_v7, 0.0 }
  0x95   :  { %v222_v20 = vadd.f32 %v221_v38, %v69_v6  ;;  %v431_v38 = vld [vmem:[%s613_s3] sm:$0xff]  ;;  %s476_s3 = smov [#allocation2]  }
  0x96   :  { %v278_v58 = vpack.c.bf16 %v269_v54, %v268_v53  ;;  %v74_v19 = vpop.permute.xlu1 %73  ;;  %v275_v23 = vpack.c.bf16 %v263_v14, %v262_v17  ;;  %s358_s19 = sshll.u32 %s476_s3, 4  ;;  %s359_s19 = int_to_ptr.vmem [resolvable:$true] %s358_s19 }
  0x97   :  { %v258_v27 = vmax.f32 %v222_v20, 0.0 }
  0x99   :  { %v236_v39 = vpop.f32.mrf.mxu2  ;;  %v251_v40 = vpop.f32.mrf.mxu3 }
  0x9a   :  { %v252_v43 = vadd.f32 %v251_v40, %v129_v31  ;;  %v223_v50 = vpop.f32.mrf.mxu0  ;;  %v237_v3 = vadd.f32 %v236_v39, %v99_v42 }
  0x9b   :  { %v224_v21 = vadd.f32 %v223_v50, %v74_v19 }
  0x9c   :  { %v270_v51 = vmax.f32 %v252_v43, 0.0  ;;  %v264_v13 = vmax.f32 %v237_v3, 0.0  ;;  %v64_v24 = vpop.permute.xlu0 %63 }
  0x9d   :  { %v259_v30 = vmax.f32 %v224_v21, 0.0  ;;  %v219_v29 = vadd.f32 %v600_v32, %v64_v24  ;;  %v292_v32 = vpop.permute.xlu2 %291 }
  0x9e   :  { %v287_v39 = vpop.permute.xlu1 %286 }
  0x9f   :  { %v257_v34 = vmax.f32 %v219_v29, 0.0  ;;  %v273_v35 = vpack.c.bf16 %v259_v30, %v258_v27 }
  0xa1   :  { %v238_v44 = vpop.f32.mrf.mxu2  ;;  %v253_v45 = vpop.f32.mrf.mxu3 }
  0xa2   :  { %v254_v48 = vadd.f32 %v253_v45, %v134_v36  ;;  %v226_v61 = vpop.f32.mrf.mxu0  ;;  %v239_v0 = vadd.f32 %v238_v44, %v104_v56  ;;  %v256_v36 = vmax.f32 %v217_v33, 0.0 }
  0xa3   :  { %v227_v18 = vadd.f32 %v226_v61, %v79_v2 }
  0xa4   :  { %v271_v52 = vmax.f32 %v254_v48, 0.0  ;;  %v265_v8 = vmax.f32 %v239_v0, 0.0 }
  0xa5   :  { %v260_v25 = vmax.f32 %v227_v18, 0.0 }
  0xa6   :  { %v279_v55 = vpack.c.bf16 %v271_v52, %v270_v51  ;;  %v276_v16 = vpack.c.bf16 %v265_v8, %v264_v13 }
  0xa8   :  { %300 = vmatpush.bf16.msra.mxu1 %v279_v55 }
  0xa9   :  { %v241_v57 = vpop.f32.mrf.mxu2 }
  0xaa   :  { %v242_v62 = vadd.f32 %v241_v57, %v109_v37  ;;  %v228_v11 = vpop.f32.mrf.mxu0  ;;  %v272_v37 = vpack.c.bf16 %v257_v34, %v256_v36 }
  0xab   :  { %v229_v15 = vadd.f32 %v228_v11, %v84_v10 }
  0xac   :  { %301 = vmatpush.bf16.msra.mxu1 %v278_v58  ;;  %v266_v4 = vmax.f32 %v242_v62, 0.0 }
  0xad   :  { %v261_v22 = vmax.f32 %v229_v15, 0.0 }
  0xaf   :  { %v274_v31 = vpack.c.bf16 %v261_v22, %v260_v25 }
  0xb1   :  { %v243_v63 = vpop.f32.mrf.mxu2 }
  0xb2   :  { %v244_v1 = vadd.f32 %v243_v63, %v114_v49 }
  0xb4   :  { %v267_v5 = vmax.f32 %v244_v1, 0.0 }
  0xb6   :  { %v277_v9 = vpack.c.bf16 %v267_v5, %v266_v4 }
  0xb8   :  { %302 = vmatpush.bf16.msra.mxu1 %v277_v9 }
  0xbc   :  { %303 = vmatpush.bf16.msra.mxu1 %v276_v16 }
  0xc0   :  { %304 = vmatpush.bf16.msra.mxu1 %v275_v23 }
  0xc4   :  { %305 = vmatpush.bf16.msra.mxu1 %v274_v31 }
  0xc8   :  { %306 = vmatpush.bf16.msra.mxu1 %v273_v35 }
  0xcc   :  { %307 = vmatpush.bf16.msra.mxu1 %v272_v37 }
  0xcf   :  { %308 = vmatmul.bf16.vlgmr.msra.gmra.mxu1 %v431_v38 }
 0x14c   :  { %v309_v40 = vpop.f32.mrf.mxu1 }
 0x14d   :  { %v310_v41 = vadd.f32 %v309_v40, %v287_v39 }
 0x14f   :  { %v420_v42 = vmul.f32 -1.442695, %v310_v41 }
 0x151   :  { %441 = vpow2.f32 %v420_v42 }
 0x154   :  { %v311_v43 = vpop.f32.mrf.mxu1 }
 0x155   :  { %v312_v28 = vadd.f32 %v311_v43, %v292_v32 }
 0x157   :  { %v442_v44 = vpop.eup %441  ;;  %v421_v45 = vmul.f32 -1.442695, %v312_v28 }
 0x158   :  { %v320_v46 = vadd.f32 1.0, %v442_v44 }
 0x159   :  { %443 = vpow2.f32 %v421_v45 }
 0x15a   :  { %445 = vrcp.f32 %v320_v46  ;;  %v333_v52 = vand.u32 2147483648, %v320_v46  ;;  %v331_v54 = vand.u32 2147483647, %v320_v46  ;;  %vm327_vm2 = vweird.f32 %v320_v46 }
 0x15c   :  { %v334_v57 = vor.u32 1.1754944e-38, %v333_v52  ;;  %vm332_vm4 = vcmp.eq.f32.partialorder %v331_v54, 8.507059e+37 }
 0x15f   :  { %v444_v47 = vpop.eup %443 }
 0x160   :  { %v446_v48 = vpop.eup %445  ;;  %v321_v49 = vadd.f32 1.0, %v444_v47 }
 0x161   :  { %v323_v50 = vmul.f32 %v446_v48, %v320_v46  ;;  %vm328_vm1 = vweird.f32 %v446_v48 }
 0x162   :  { %447 = vrcp.f32 %v321_v49  ;;  %vm329_vm3 = vmor %vm327_vm2, %vm328_vm1  ;;  %v348_v62 = vand.u32 2147483648, %v321_v49  ;;  %v346_v0 = vand.u32 2147483647, %v321_v49  ;;  %vm342_vm6 = vweird.f32 %v321_v49 }
 0x163   :  { %v324_v51 = vsub.f32 1.0, %v323_v50 }
 0x164   :  { %v349_v2 = vor.u32 1.1754944e-38, %v348_v62  ;;  %vm347_vm8 = vcmp.eq.f32.partialorder %v346_v0, 8.507059e+37 }
 0x165   :  { %v325_v53 = vmul.f32 %v446_v48, %v324_v51 }
 0x167   :  { %v326_v55 = vadd.f32 %v446_v48, %v325_v53 }
 0x168   :  { %v448_v56 = vpop.eup %447 }
 0x169   :  { %v338_v58 = vmul.f32 %v448_v56, %v321_v49  ;;  %v330_v59 = vsel %vm329_vm3, %v446_v48, %v326_v55  ;;  %vm343_vm5 = vweird.f32 %v448_v56 }
 0x16a   :  { %v335_v60 = vsel %vm332_vm4, %v334_v57, %v330_v59  ;;  %vm344_vm7 = vmor %vm342_vm6, %vm343_vm5 }
 0x16b   :  { %v339_v61 = vsub.f32 1.0, %v338_v58  ;;  %352 = vst [vmem:[#allocation2] sm:$0xff] %v335_v60 }
 0x16d   :  { %v340_v63 = vmul.f32 %v448_v56, %v339_v61 }
 0x16f   :  { %v341_v1 = vadd.f32 %v448_v56, %v340_v63 }
 0x171   :  { %v345_v3 = vsel %vm344_vm7, %v448_v56, %v341_v1 }
 0x172   :  { %v350_v4 = vsel %vm347_vm8, %v349_v2, %v345_v3 }
 0x173   :  { %353 = vst [vmem:[#allocation2 + $0x8] sm:$0xff] %v350_v4 }
 0x174   :  { %366 = dma.vmem_to_hbm [thread:$0]  %s359_s19, 256, %s361_s22, [#allocation3], %s477_s23, %s477_s23, %s478_s24  }
 0x175   :  { %473 = dma.done.wait [#allocation3], 256  }
 0x176   :  { %474 = vsyncadd [#allocation3], 4294967040 }
 0x177   :  { %371 = vsyncpa [#allocation3], 1 }

</bundles_post_ra>
